<compile_context>
chip_gen: v7x
topology: tpu7x:2x2x1
jax: 0.10.0
libtpu: 0.0.40
codegen_flags: <defaults>
</compile_context>

<pallas_src>
import math

import jax
import jax.numpy as jnp
from jax import lax
from jax.experimental import pallas as pl
from jax.experimental.pallas import tpu as pltpu

_NEG_INF = float(jnp.finfo(jnp.float32).min)
_VMEM_FLOOR = 32 * 1024 * 1024
_VMEM_CAP = 56 * 1024 * 1024          # stays under v7x's 64 MiB physical VMEM


def _pick_tile(dim, preferred, grain):
    """Largest t <= preferred with dim % t == 0 and (t % grain == 0 or t == dim)."""
    t = min(dim, preferred)
    while t > 0:
        if dim % t == 0 and (t % grain == 0 or t == dim):
            return t
        t -= 1
    return dim


def _compiler_params(dimension_semantics, vmem_bytes):
    limit = int(min(_VMEM_CAP, max(_VMEM_FLOOR, 2 * vmem_bytes)))
    return pltpu.CompilerParams(
        dimension_semantics=dimension_semantics,
        vmem_limit_bytes=limit,
    )


# ------------------------- tiled, K-looped matmul --------------------------

def _matmul_kernel(x_ref, w_ref, o_ref, acc_ref):
    @pl.when(pl.program_id(2) == 0)
    def _init():
        acc_ref[...] = jnp.zeros_like(acc_ref)

    acc_ref[...] += jnp.dot(
        x_ref[...], w_ref[...], preferred_element_type=jnp.float32
    )

    @pl.when(pl.program_id(2) == pl.num_programs(2) - 1)
    def _store():
        o_ref[...] = acc_ref[...].astype(o_ref.dtype)


def pallas_matmul(x, w, *, tm=512, tn=256, tk=512, out_dtype=None):
    """x: (M, K) @ w: (K, N) -> (M, N); fp32 accumulation in VMEM scratch."""
    M, K = x.shape
    K2, N = w.shape
    assert K == K2
    out_dtype = out_dtype if out_dtype is not None else x.dtype
    tm = _pick_tile(M, tm, grain=8)
    tn = _pick_tile(N, tn, grain=128)
    tk = _pick_tile(K, tk, grain=128)
    grid = (M // tm, N // tn, K // tk)

    xb = jnp.dtype(x.dtype).itemsize
    wb = jnp.dtype(w.dtype).itemsize
    ob = jnp.dtype(out_dtype).itemsize
    vmem = 2 * tm * tk * xb + 2 * tk * tn * wb + 2 * tm * tn * ob + tm * tn * 4

    return pl.pallas_call(
        _matmul_kernel,
        out_shape=jax.ShapeDtypeStruct((M, N), out_dtype),
        grid=grid,
        in_specs=[
            pl.BlockSpec((tm, tk), lambda i, j, k: (i, k)),
            pl.BlockSpec((tk, tn), lambda i, j, k: (k, j)),
        ],
        out_specs=pl.BlockSpec((tm, tn), lambda i, j, k: (i, j)),
        scratch_shapes=[pltpu.VMEM((tm, tn), jnp.float32)],
        compiler_params=_compiler_params(("parallel", "parallel", "arbitrary"), vmem),
    )(x, w)


# ------------------------------ K RoPE pre-pass ------------------------------

def _rope_kernel(x_ref, cos_ref, sin_ref, o_ref):
    # blocks: x/o -> (1, ts, Dh); cos/sin -> (1, ts, Dh) fp32
    x = x_ref[0].astype(jnp.float32)
    half = x.shape[-1] // 2
    rot = jnp.concatenate([-x[:, half:], x[:, :half]], axis=-1)   # rotate_half
    o_ref[0] = (x * cos_ref[0] + rot * sin_ref[0]).astype(o_ref.dtype)


def pallas_rope(x, cos, sin, *, num_heads, head_dim, head_offset=0, ts=512,
                out_dtype=jnp.bfloat16):
    """Rotate `num_heads` Dh-chunks of a lane-dense (B, S, n*Dh) slab.

    Heads are the innermost grid axis so the (head-independent) cos/sin blocks
    keep the same block index across consecutive grid steps (DMA elided).
    """
    B, S, _ = x.shape
    ts = _pick_tile(S, ts, grain=8)
    grid = (B, S // ts, num_heads)

    xb = jnp.dtype(x.dtype).itemsize
    vmem = 2 * ts * head_dim * xb + 2 * 2 * ts * head_dim * 4 + 2 * ts * head_dim * 2

    return pl.pallas_call(
        _rope_kernel,
        out_shape=jax.ShapeDtypeStruct((B, S, num_heads * head_dim), out_dtype),
        grid=grid,
        in_specs=[
            pl.BlockSpec((1, ts, head_dim),
                         lambda b, si, h: (b, si, head_offset + h)),
            pl.BlockSpec((1, ts, head_dim), lambda b, si, h: (b, si, 0)),
            pl.BlockSpec((1, ts, head_dim), lambda b, si, h: (b, si, 0)),
        ],
        out_specs=pl.BlockSpec((1, ts, head_dim), lambda b, si, h: (b, si, h)),
        compiler_params=_compiler_params(("parallel", "parallel", "parallel"), vmem),
    )(x, cos, sin)


# -------------------------- causal flash attention --------------------------

def _flash_attn_kernel(q_ref, k_ref, v_ref, cos_ref, sin_ref, o_ref,
                       qrot_sc, m_sc, l_sc, acc_sc):
    # q_ref/o_ref: (1, T, G*Dh); k_ref/v_ref: (1, T, Dh); cos/sin: (1, T, Dh)
    qi = pl.program_id(2)
    ki = pl.program_id(3)
    T = k_ref.shape[1]
    Dh = k_ref.shape[2]
    G = q_ref.shape[2] // Dh
    half = Dh // 2

    @pl.when(ki == 0)
    def _init():
        m_sc[...] = jnp.full_like(m_sc, -jnp.inf)
        l_sc[...] = jnp.zeros_like(l_sc)
        acc_sc[...] = jnp.zeros_like(acc_sc)
        # fused Q RoPE: rotate all G query heads of this group once per q tile.
        # q is already pre-scaled by 1/sqrt(Dh) (folded into the weight).
        c = cos_ref[0]                                   # (T, Dh) fp32
        s = sin_ref[0]
        for g in range(G):                               # static unroll; G small
            qg = q_ref[0, :, g * Dh:(g + 1) * Dh].astype(jnp.float32)
            rot = jnp.concatenate([-qg[:, half:], qg[:, :half]], axis=-1)
            qrot_sc[g * T:(g + 1) * T, :] = (qg * c + rot * s).astype(qrot_sc.dtype)

    # causal tile skip (KV DMA is also elided via clamped index_maps)
    @pl.when(ki <= qi)
    def _compute():
        q = qrot_sc[...]                                 # (G*T, Dh) bf16
        k = k_ref[0]                                     # (T, Dh)  bf16
        v = v_ref[0]                                     # (T, Dh)  bf16
        scores = lax.dot_general(
            q, k, (((1,), (1,)), ((), ())),
            preferred_element_type=jnp.float32,
        )                                                # (G*T, T) fp32

        def online_softmax_update(s_blk):
            m_prev = m_sc[...]
            m_new = jnp.maximum(m_prev, jnp.max(s_blk, axis=-1, keepdims=True))
            alpha = jnp.exp(m_prev - m_new)
            p = jnp.exp(s_blk - m_new)
            l_sc[...] = alpha * l_sc[...] + jnp.sum(p, axis=-1, keepdims=True)
            acc_sc[...] = alpha * acc_sc[...] + jnp.dot(
                p.astype(v.dtype), v, preferred_element_type=jnp.float32)
            m_sc[...] = m_new

        @pl.when(ki == qi)          # diagonal tile: apply the causal mask
        def _diag():
            rows = lax.broadcasted_iota(jnp.int32, (G, T, T), 1).reshape(G * T, T)
            cols = lax.broadcasted_iota(jnp.int32, (G, T, T), 2).reshape(G * T, T)
            online_softmax_update(jnp.where(rows >= cols, scores, _NEG_INF))

        @pl.when(ki < qi)           # interior tile: fully below the diagonal
        def _interior():
            online_softmax_update(scores)

    @pl.when(ki == pl.num_programs(3) - 1)
    def _finalize():
        acc = acc_sc[...] / l_sc[...]
        for g in range(G):
            o_ref[0, :, g * Dh:(g + 1) * Dh] = (
                acc[g * T:(g + 1) * T, :].astype(o_ref.dtype))


def pallas_flash_attention(qkv, k_rot, cos, sin, *, num_heads, num_kv_heads,
                           head_dim, v_head_offset, tile=256):
    """
    qkv:   (B, S, (H+2*KVH)*Dh) bf16 fused projection (q pre-scaled by 1/sqrt(Dh));
           un-rotated q and v are read directly from it.
    k_rot: (B, S, KVH*Dh) bf16 rotated keys.
    cos/sin: (B, S, Dh) fp32 rotary tables (q rotation is fused in-kernel).
    returns: (B, S, H*Dh) bf16, lane-dense (feeds o_proj with a free reshape).
    """
    B, S, _ = qkv.shape
    G = num_heads // num_kv_heads
    assert head_dim % 128 == 0 and head_dim % 2 == 0
    T = _pick_tile(S, tile, grain=8)       # tq == tkv -> diagonal rows always
    grid = (B, num_kv_heads, S // T, S // T)  # have >=1 unmasked key

    vmem = (2 * T * G * head_dim * 2 * 2        # q block + out block (bf16, 2x buf)
            + 2 * 2 * T * head_dim * 2          # k, v blocks
            + 2 * 2 * T * head_dim * 4          # cos, sin blocks (fp32)
            + G * T * head_dim * 2              # qrot scratch
            + 2 * G * T * 4                     # m, l scratch
            + G * T * head_dim * 4)             # acc scratch

    return pl.pallas_call(
        _flash_attn_kernel,
        out_shape=jax.ShapeDtypeStruct((B, S, num_heads * head_dim), qkv.dtype),
        grid=grid,
        in_specs=[
            # un-rotated q: all G heads of group `kvh` (contiguous in the slab)
            pl.BlockSpec((1, T, G * head_dim),
                         lambda b, kvh, qi, ki: (b, qi, kvh)),
            # rotated k; clamp to the diagonal block so skipped tiles aren't DMA'd
            pl.BlockSpec((1, T, head_dim),
                         lambda b, kvh, qi, ki: (b, jnp.minimum(ki, qi), kvh)),
            # v straight out of the fused qkv slab, same causal clamp
            pl.BlockSpec((1, T, head_dim),
                         lambda b, kvh, qi, ki: (b, jnp.minimum(ki, qi),
                                                 v_head_offset + kvh)),
            pl.BlockSpec((1, T, head_dim),
                         lambda b, kvh, qi, ki: (b, qi, 0)),
            pl.BlockSpec((1, T, head_dim),
                         lambda b, kvh, qi, ki: (b, qi, 0)),
        ],
        out_specs=pl.BlockSpec((1, T, G * head_dim),
                               lambda b, kvh, qi, ki: (b, qi, kvh)),
        scratch_shapes=[
            pltpu.VMEM((G * T, head_dim), jnp.bfloat16),   # rotated q (group)
            pltpu.VMEM((G * T, 1), jnp.float32),           # running max m
            pltpu.VMEM((G * T, 1), jnp.float32),           # running denom l
            pltpu.VMEM((G * T, head_dim), jnp.float32),    # output accumulator
        ],
        compiler_params=_compiler_params(
            ("parallel", "parallel", "parallel", "arbitrary"), vmem),
    )(qkv, k_rot, qkv, cos, sin)


# ----------------------------- module wrapper -------------------------------

class GemmoeDynFlashAttention2Pallas:
    def __init__(self, hidden_size, num_heads, num_kv_heads, head_dim,
                 rope_theta=10000.0, key=jax.random.PRNGKey(0)):
        self.hidden_size = hidden_size
        self.num_heads = num_heads
        self.num_kv_heads = num_kv_heads
        self.head_dim = head_dim
        self.num_kv_groups = num_heads // num_kv_heads
        self.rope_theta = rope_theta

        k1, k2, k3, k4 = jax.random.split(key, 4)
        std = 0.02
        # nn.Linear(in, out) weight is (out, in); store transposed (in, out).
        # fp32 masters (reference), bf16 copies for the kernels.
        self.wq = (jax.random.normal(k1, (hidden_size, num_heads * head_dim)) * std).astype(jnp.float32)
        self.wk = (jax.random.normal(k2, (hidden_size, num_kv_heads * head_dim)) * std).astype(jnp.float32)
        self.wv = (jax.random.normal(k3, (hidden_size, num_kv_heads * head_dim)) * std).astype(jnp.float32)
        self.wo = (jax.random.normal(k4, (num_heads * head_dim, hidden_size)) * std).astype(jnp.float32)
        scale = 1.0 / math.sqrt(head_dim)
        # fused q|k|v bf16 weight; 1/sqrt(Dh) folded into the q columns so the
        # attention kernel never rescales scores.
        self.w_qkv = jnp.concatenate(
            [self.wq * scale, self.wk, self.wv], axis=1).astype(jnp.bfloat16)
        self.wo_bf16 = self.wo.astype(jnp.bfloat16)
        # attention_bias=False (Gemmoe default) -> no biases

    def _rotary(self, position_ids):
        # position_ids: (B, S) -> cos, sin: (B, S, head_dim), fp32
        dim = self.head_dim
        inv_freq = 1.0 / (self.rope_theta
                          ** (jnp.arange(0, dim, 2, dtype=jnp.float32) / dim))
        freqs = position_ids.astype(jnp.float32)[:, :, None] * inv_freq[None, None, :]
        emb = jnp.concatenate([freqs, freqs], axis=-1)
        return jnp.cos(emb), jnp.sin(emb)

    def __call__(self, hidden_states, position_ids=None):
        # hidden_states: (B, S, hidden)
        B, S, Dm = hidden_states.shape
        H, KVH, Dh = self.num_heads, self.num_kv_heads, self.head_dim
        if position_ids is None:
            position_ids = jnp.broadcast_to(
                jnp.arange(S, dtype=jnp.int32)[None, :], (B, S))

        # fused qkv projection: one tiled bf16 matmul, lane-dense [q|k|v] slab
        x2d = hidden_states.reshape(B * S, Dm).astype(jnp.bfloat16)
        qkv = pallas_matmul(x2d, self.w_qkv, out_dtype=jnp.bfloat16)
        qkv = qkv.reshape(B, S, (H + 2 * KVH) * Dh)

        cos, sin = self._rotary(position_ids)

        # K RoPE pre-pass (once per KV head); Q rotation is fused into the
        # attention kernel, so no Q HBM round-trip.
        k_rot = pallas_rope(qkv, cos, sin, num_heads=KVH, head_dim=Dh,
                            head_offset=H)

        attn = pallas_flash_attention(
            qkv, k_rot, cos, sin,
            num_heads=H, num_kv_heads=KVH, head_dim=Dh,
            v_head_offset=H + KVH)                       # (B, S, H*Dh) bf16

        out = pallas_matmul(attn.reshape(B * S, H * Dh), self.wo_bf16,
                            out_dtype=jnp.float32)
        return out.reshape(B, S, self.hidden_size)


# -------------------------------- reference ---------------------------------

def reference_forward(mod, hidden_states, position_ids):
    P = lax.Precision.HIGHEST
    B, S, Dm = hidden_states.shape
    H, KVH, Dh = mod.num_heads, mod.num_kv_heads, mod.head_dim
    x2d = hidden_states.reshape(B * S, Dm)
    q = jnp.dot(x2d, mod.wq, precision=P).reshape(B, S, H, Dh).transpose(0, 2, 1, 3)
    k = jnp.dot(x2d, mod.wk, precision=P).reshape(B, S, KVH, Dh).transpose(0, 2, 1, 3)
    v = jnp.dot(x2d, mod.wv, precision=P).reshape(B, S, KVH, Dh).transpose(0, 2, 1, 3)
    cos, sin = mod._rotary(position_ids)
    cos_b, sin_b = cos[:, None], sin[:, None]

    def rot_half(x):
        h = x.shape[-1] // 2
        return jnp.concatenate([-x[..., h:], x[..., :h]], axis=-1)

    q = q * cos_b + rot_half(q) * sin_b
    k = k * cos_b + rot_half(k) * sin_b
    k = jnp.repeat(k, mod.num_kv_groups, axis=1)
    v = jnp.repeat(v, mod.num_kv_groups, axis=1)
    scores = jnp.einsum("bhqd,bhkd->bhqk", q, k, precision=P) / math.sqrt(Dh)
    mask = jnp.tril(jnp.ones((S, S), dtype=bool))
    scores = jnp.where(mask[None, None], scores, _NEG_INF)
    p = jax.nn.softmax(scores.astype(jnp.float32), axis=-1)
    attn = jnp.einsum("bhqk,bhkd->bhqd", p, v, precision=P)
    attn = attn.transpose(0, 2, 1, 3).reshape(B * S, H * Dh)
    return jnp.dot(attn, mod.wo, precision=P).reshape(B, S, mod.hidden_size)


# ----------------------------------- main ------------------------------------

if __name__ == "__main__":
    B, S = 2, 8
    hidden_size = 256
    num_heads = 4
    num_kv_heads = 2
    head_dim = 128     # Gemmoe-style: head_dim is independent of hidden/num_heads

    key = jax.random.PRNGKey(0)
    k_in, k_par = jax.random.split(key)
    hidden_states = jax.random.normal(k_in, (B, S, hidden_size), dtype=jnp.float32)
    position_ids = jnp.broadcast_to(jnp.arange(S, dtype=jnp.int32)[None, :], (B, S))

    mod = GemmoeDynFlashAttention2Pallas(
        hidden_size, num_heads, num_kv_heads, head_dim, key=k_par)

    out = mod(hidden_states, position_ids)
    out = jax.block_until_ready(out)

    ref = reference_forward(mod, hidden_states, position_ids)
    assert out.shape == (B, S, hidden_size)
    max_err = float(jnp.max(jnp.abs(out - ref)))
    assert jnp.allclose(out, ref, rtol=2e-2, atol=2e-2), (
        f"mismatch vs reference (max abs err {max_err})")

    print("KERNEL_OK")
</pallas_src>

<mosaic_0001>
module attributes {stable_mosaic.version = 11 : i64} {
  func.func @_matmul_kernel(%arg0: i32, %arg1: i32, %arg2: i32, %arg3: memref<16x256xbf16, #tpu.memory_space<vmem>>, %arg4: memref<256x256xbf16, #tpu.memory_space<vmem>>, %arg5: memref<16x256xbf16, #tpu.memory_space<vmem>>, %arg6: memref<16x256xf32, #tpu.memory_space<vmem>>) attributes {dimension_semantics = [#tpu.dimension_semantics<parallel>, #tpu.dimension_semantics<parallel>, #tpu.dimension_semantics<arbitrary>], iteration_bounds = array<i64: 1, 4, 1>, scalar_prefetch = 0 : i64, scratch_operands = 1 : i64, tpu.core_type = #tpu.core_type<tc>, window_params = [{transform_indices = @transform_0, window_bounds = array<i64: 16, 256>}, {transform_indices = @transform_1, window_bounds = array<i64: 256, 256>}, {transform_indices = @transform_2, window_bounds = array<i64: 16, 256>}]} {
    %c0_i32 = arith.constant 0 : i32
    %0 = arith.cmpi eq, %arg2, %c0_i32 : i32
    %1 = arith.extui %0 : i1 to i32
    %c0_i32_0 = arith.constant 0 : i32
    %2 = arith.cmpi ne, %1, %c0_i32_0 : i32
    scf.if %2 {
      %cst_10 = arith.constant 0.000000e+00 : f32
      %12 = vector.broadcast %cst_10 : f32 to vector<16x256xf32>
      %c0_11 = arith.constant 0 : index
      %c0_12 = arith.constant 0 : index
      %13 = vector.load %arg6[%c0_11, %c0_12] : memref<16x256xf32, #tpu.memory_space<vmem>>, vector<16x256xf32>
      tpu.vector_store %arg6[%c0_11, %c0_12], %12 {strides = array<i32>} : memref<16x256xf32, #tpu.memory_space<vmem>>, vector<16x256xf32>,
    } else {
    }
    %c0 = arith.constant 0 : index
    %c0_1 = arith.constant 0 : index
    %3 = vector.load %arg6[%c0, %c0_1] : memref<16x256xf32, #tpu.memory_space<vmem>>, vector<16x256xf32>
    %c0_2 = arith.constant 0 : index
    %c0_3 = arith.constant 0 : index
    %4 = vector.load %arg3[%c0_2, %c0_3] : memref<16x256xbf16, #tpu.memory_space<vmem>>, vector<16x256xbf16>
    %c0_4 = arith.constant 0 : index
    %c0_5 = arith.constant 0 : index
    %5 = vector.load %arg4[%c0_4, %c0_5] : memref<256x256xbf16, #tpu.memory_space<vmem>>, vector<256x256xbf16>
    %cst = arith.constant dense<0.000000e+00> : vector<16x256xf32>
    %6 = tpu.matmul %4, %5, %cst {dimension_numbers = #tpu.dot_dimension_numbers<[1], [0], [0], [1], [0, 0, 1, 1], [], []>} : vector<16x256xbf16>, vector<256x256xbf16>, vector<16x256xf32> -> vector<16x256xf32>
    %7 = arith.addf %3, %6 : vector<16x256xf32>
    %c0_6 = arith.constant 0 : index
    %c0_7 = arith.constant 0 : index
    %8 = vector.load %arg6[%c0_6, %c0_7] : memref<16x256xf32, #tpu.memory_space<vmem>>, vector<16x256xf32>
    tpu.vector_store %arg6[%c0_6, %c0_7], %7 {strides = array<i32>} : memref<16x256xf32, #tpu.memory_space<vmem>>, vector<16x256xf32>,
    %c0_i32_8 = arith.constant 0 : i32
    %9 = arith.cmpi eq, %arg2, %c0_i32_8 : i32
    %10 = arith.extui %9 : i1 to i32
    %c0_i32_9 = arith.constant 0 : i32
    %11 = arith.cmpi ne, %10, %c0_i32_9 : i32
    scf.if %11 {
      %c0_10 = arith.constant 0 : index
      %c0_11 = arith.constant 0 : index
      %12 = vector.load %arg6[%c0_10, %c0_11] : memref<16x256xf32, #tpu.memory_space<vmem>>, vector<16x256xf32>
      %13 = arith.truncf %12 : vector<16x256xf32> to vector<16x256xbf16>
      %c0_12 = arith.constant 0 : index
      %c0_13 = arith.constant 0 : index
      %14 = vector.load %arg5[%c0_12, %c0_13] : memref<16x256xbf16, #tpu.memory_space<vmem>>, vector<16x256xbf16>
      tpu.vector_store %arg5[%c0_12, %c0_13], %13 {strides = array<i32>} : memref<16x256xbf16, #tpu.memory_space<vmem>>, vector<16x256xbf16>,
    } else {
    }
    return
  }
  func.func @transform_0(%arg0: i32, %arg1: i32, %arg2: i32) -> (i32, i32) {
    %c0_i32 = arith.constant 0 : i32
    return %arg0, %arg2 : i32, i32
  }
  func.func @transform_1(%arg0: i32, %arg1: i32, %arg2: i32) -> (i32, i32) {
    %c0_i32 = arith.constant 0 : i32
    return %arg2, %arg1 : i32, i32
  }
  func.func @transform_2(%arg0: i32, %arg1: i32, %arg2: i32) -> (i32, i32) {
    %c0_i32 = arith.constant 0 : i32
    return %arg0, %arg1 : i32, i32
  }
}

</mosaic_0001>

<bundles_post_ra>
// kernel: tpu_custom_call.1
= control target key start
LH: loop header
LB: loop body
LE: loop exit
PB: predicated region body
PF: predicated region fallthrough
CT: control target
= control target key end

     0   :  { %7 = vsyncpa [#allocation4], 0  ;;  %s1242_s0 = inlined_call_operand.hbm [shape: bf16[16,256], index: 0, kind: input, shape index: {}]   ;;  %s1243_s1 = inlined_call_operand.hbm [shape: bf16[256,1024], index: 1, kind: input, shape index: {}]   ;;  %s1244_s2 = inlined_call_operand.hbm [shape: bf16[16,1024], index: 2, kind: output, shape index: {}]  }
   0x1   :  { %8 = vsyncpa [#allocation7], 0 }
   0x2   :  { %10 = vsyncpa [#allocation7 + $0x1], 0 }
   0x3   :  { %11 = vsyncpa [#allocation5], 0 }
   0x4   :  { %13 = vsyncpa [#allocation5 + $0x1], 0  ;;  %s991_s9 = smov 0   ;;  %s993_s10 = smov 0  }
   0x5   :  { %s995_s11 = smov 0   ;;  %s997_s12 = smov 0  }
   0x6   :  { %s999_s13 = smov 0   ;;  %s1001_s14 = smov 0  }
   0x7 LB: > { %s634_s15 = sadd.s32 4294967295, %s965_s14   ;;  %s635_s16 = sadd.s32 4294967294, %s965_s14   ;;  %s965_s14 = sphi %s1001_s14, %s19_s14   ;;  %s961_s13 = sphi %s999_s13, %s1269_s13   ;;  %s957_s12 = sphi %s997_s12, %s1268_s12   ;;  %s953_s11 = sphi %s995_s11, %s1267_s11   ;;  %s949_s10 = sphi %s993_s10, %s1266_s10   ;;  %s945_s9 = sphi %s991_s9, %s1265_s9  }
   0x8   : > { %p82_p0 = scmp.ne.s32.totalorder %s953_s11, %s949_s10  ;;  %p83_p1 = scmp.eq.s32.totalorder %s965_s14, 0 }
   0x9   : > { %p88_p2 = scmp.ne.s32.totalorder %s949_s10, %s945_s9  ;;  %p1028_p3 = scmp.eq.s32.totalorder %s634_s15, 0 }
   0xa   : > { %p1032_p4 = por %p83_p1, %p82_p0  ;;  %p114_p5 = scmp.eq.s32.totalorder %s634_s15, 3 }
   0xb   : > { %s1251_s17 = scalar_select %p1028_p3, 1, 0 }
   0xc   : > { %p1038_p6 = por %p1028_p3, %p88_p2  ;;  %p120_p7 = scmp.eq.s32.totalorder %s635_s16, 3 }
   0xd   : > { %p1042_p8 = por %p114_p5, %p82_p0  ;;  %p636_p9 = scmp.ge.s32.totalorder %s965_s14, 1 }
   0xe   : > { %s1253_s19 = scalar_select %p1038_p6, 1, 0 }
   0xf   : > { %s1254_s20 = scalar_select %p1042_p8, 1, 0 }
  0x10   : > { %p1047_p10 = por %p120_p7, %p88_p2  ;;  %p127_p11 = scmp.lt.s32.totalorder %s965_s14, 5 }
  0x11   : > { %s967_s23 = smov [#allocation3]   ;;  %p712_p0 = scmp.lt.s32.totalorder %s965_s14, 4 }
  0x12   : > { %s1255_s21 = scalar_select %p1047_p10, 1, 0 }
  0x13   : > { %p1052_p12 = pnand %p636_p9, %p127_p11  ;;  %s145_s24 = sshll.u32 %s967_s23, 4  ;;  %s146_s24 = int_to_ptr.vmem [resolvable:$true] %s145_s24 }
  0x14   : > { %p1067_p2 = pnand %p712_p0, %p1032_p4  ;;  %s34_s27 = sadd.s32 1, %s961_s13 }
  0x15   : > { %s1256_s22 = scalar_select %p1052_p12, 1, 0 }
  0x16   : > { %p699_p13 = pneg %p1052_p12  ;;  %s821_s30 = scalar_lea.hbm %s1242_s0, 256 }
  0x17   : > { %s1258_s26 = scalar_select %p1067_p2, 1, 0 }
  0x18   : > { %p1061_p1 = pnand %p699_p13, %p1028_p3  ;;  %p822_p5 = scmp.ne.s32.totalorder %s1242_s0, %s821_s30 }
  0x19   : > { %p828_p4 = scmp.lt.u32.totalorder %s821_s30, %s1242_s0 }
  0x1a   : > { %p823_p7 = pneg %p1061_p1 }
  0x1c   : > { %p824_p9 = pnand %p823_p7, %p822_p5 }
  0x1e   : > { %p825_p11 = pneg %p824_p9 }
  0x20   : > { %p830_p13 = pnand %p828_p4, %p825_p11 }
  0x22   : > { %833 = shalt.err (!%p830_p13)
}
  0x23   : > { %s834_s7 = scalar_lea.vmem %s146_s24, 256  ;;  %p842_p6 = scmp.lt.s32.totalorder %s146_s24, %s146_s24 }
  0x24   : > { %p835_p0 = scmp.ne.s32.totalorder %s146_s24, %s834_s7  ;;  %p843_p3 = scmp.lt.s32.totalorder %s834_s7, %s834_s7 }
  0x26   : > { %p837_p10 = pnand %p835_p0, %p823_p7  ;;  %p844_p12 = por %p843_p3, %p842_p6 }
  0x28   : > { %p838_p8 = pneg %p837_p10 }
  0x2a   : > { %p845_p2 = pnand %p844_p12, %p838_p8 }
  0x2c   : > { %848 = shalt.err (!%p845_p2)
}
  0x2d   : > { %s968_s8 = smov 128   ;;  %s969_s15 = smov 8  }
  0x2e   : > { %702 = dma.hbm_to_vmem [thread:$0]  (!%p1061_p1), %s1242_s0, 256, %s146_s24, [#allocation4], %s968_s8, %s968_s8, %s969_s15  }
  0x2f   : > { %p36_p10 = scmp.ge.s32.totalorder %s34_s27, 4  ;;  %s75_s23 = sadd.s32 1, %s953_s11 }
  0x30   : > { %s159_s28 = sand.u32 1, %s953_s11   ;;  %s687_s3 = sshll.u32 %s961_s13, 7 }
  0x31   : > { %s1271_s27 = smov (%p36_p10, %s34_s27), 0  ;;  %s639_s29 = sshll.u32 %s159_s28, 8 }
  0x32   : > { %s71_s30 = ssub.s32 %s961_s13, %s1271_s27  ;;  %s1101_s5 = scalar_lea.hbm %s1243_s1, %s687_s3 }
  0x33   : > { %p73_p3 = scmp.eq.s32.totalorder %s71_s30, 0  ;;  %s163_s24 = scalar_lea.vmem [#allocation6], %s639_s29 }
  0x34   : > { %s173_s6 = sshll.u32 %s163_s24, 4  ;;  %s1108_s16 = scalar_lea.sflag [#allocation7], %s159_s28  ;;  %s1106_s6 = int_to_ptr.vmem [resolvable:$true] %s173_s6 }
  0x35   : > { %s1104_s7 = scalar_select %p73_p3, %s953_s11, %s75_s23  }
  0x36   : > { %s849_s18 = scalar_lea.hbm %s1101_s5, 4096  ;;  %p1259_p8 = scmp.ne.s32.totalorder %s1258_s26, 0 }
  0x37   : > { %p850_p6 = scmp.ne.s32.totalorder %s1101_s5, %s849_s18  ;;  %s854_s25 = scalar_lea.hbm %s1243_s1, 16384 }
  0x38   : > { %p851_p12 = pneg %p1259_p8  ;;  %p855_p5 = scmp.lt.u32.totalorder %s1101_s5, %s1243_s1 }
  0x39   : > { %p856_p7 = scmp.lt.u32.totalorder %s854_s25, %s849_s18  ;;  %p858_p11 = scmp.lt.u32.totalorder %s849_s18, %s1101_s5 }
  0x3a   : > { %p852_p1 = pnand %p851_p12, %p850_p6 }
  0x3b   : > { %p857_p9 = por %p856_p7, %p855_p5 }
  0x3c   : > { %p853_p2 = pneg %p852_p1 }
  0x3d   : > { %p859_p4 = por %p858_p11, %p857_p9 }
  0x3f   : > { %p860_p13 = pnand %p859_p4, %p853_p2 }
  0x41   : > { %863 = shalt.err (!%p860_p13)
}
  0x42   : > { %s864_s23 = scalar_lea.vmem %s1106_s6, 4096  ;;  %s970_s28 = smov [#allocation6]  }
  0x43   : > { %p865_p0 = scmp.ne.s32.totalorder %s1106_s6, %s864_s23  ;;  %s869_s24 = sshll.u32 %s970_s28, 4  ;;  %s870_s24 = int_to_ptr.vmem [resolvable:$false] %s869_s24 }
  0x44   : > { %s871_s30 = scalar_lea.vmem %s870_s24, 8192  ;;  %p872_p6 = scmp.lt.s32.totalorder %s1106_s6, %s870_s24 }
  0x45   : > { %p867_p10 = pnand %p865_p0, %p851_p12  ;;  %p873_p1 = scmp.lt.s32.totalorder %s871_s30, %s864_s23 }
  0x47   : > { %p868_p3 = pneg %p867_p10  ;;  %p874_p5 = por %p873_p1, %p872_p6 }
  0x49   : > { %p875_p7 = pnand %p874_p5, %p868_p3 }
  0x4b   : > { %878 = shalt.err (!%p875_p7)
}
  0x4c   : > { %s971_s18 = smov 512   ;;  %p1260_p12 = scmp.ne.s32.totalorder %s1256_s22, 0 }
  0x4d   : > { %706 = dma.hbm_to_vmem [thread:$0]  (!%p1259_p8), %s1101_s5, 4096, %s1106_s6, %s1108_s16, %s971_s18, %s968_s8, %s969_s15  }
  0x4e   : > { %185 = sbr.rel (%p1260_p12) target bundleno = 388 (0x184), region = 28  ;;  %p1261_p2 = scmp.ne.s32.totalorder (!%p1260_p12), %s1251_s17, 0 }
  0x55   : > { %932 = dma.done.wait (%p1261_p2), [#allocation4], 256  }
  0x56   : > { %934 = vsyncadd (%p1261_p2), [#allocation4], 4294967040  ;;  %s1145_s3 = sand.u32 1, %s949_s10   ;;  %p1262_p8 = scmp.ne.s32.totalorder %s1253_s19, 0 }
  0x57   : > { %s644_s26 = sshll.u32 %s1145_s3, 8  ;;  %s192_s25 = scalar_lea.sflag [#allocation7], %s1145_s3 }
  0x58   : > { %s1149_s29 = scalar_lea.vmem [#allocation6], %s644_s26 }
  0x59   : > { %936 = dma.done.wait (%p1262_p8), %s192_s25, 4096  }
  0x5a   : > { %938 = vsyncadd (%p1262_p8), %s192_s25, 4294963200  ;;  %v770_v0 = vld [vmem:[%s1149_s29 + $0x4] ss:$8 sps:$4 sm:$0xff]   ;;  %v772_v1 = vld [vmem:[%s1149_s29] ss:$8 sps:$4 sm:$0xff]   ;;  %s645_s17 = sshll.u32 %s1145_s3, 4 }
  0x5b   : > { %438 = vmatprep.subr.bf16.mxu0 %v770_v0  ;;  %v773_v2 = vld [vmem:[%s1149_s29 + $0x14] ss:$8 sps:$4 sm:$0xff]   ;;  %v775_v3 = vld [vmem:[%s1149_s29 + $0x10] ss:$8 sps:$4 sm:$0xff]   ;;  %v776_v4 = vld [vmem:[%s1149_s29 + $0x24] ss:$8 sps:$4 sm:$0xff]  }
  0x5c   : > { %439 = vmatpush1.bf16.msra.mxu0 %v772_v1  ;;  %v778_v5 = vld [vmem:[%s1149_s29 + $0x20] ss:$8 sps:$4 sm:$0xff]   ;;  %v779_v6 = vld [vmem:[%s1149_s29 + $0x34] ss:$8 sps:$4 sm:$0xff]   ;;  %v781_v7 = vld [vmem:[%s1149_s29 + $0x30] ss:$8 sps:$4 sm:$0xff]  }
  0x5d   : > { %440 = vmatprep.subr.bf16.mxu0 %v773_v2  ;;  %v782_v8 = vld [vmem:[%s1149_s29 + $0x44] ss:$8 sps:$4 sm:$0xff]   ;;  %v784_v9 = vld [vmem:[%s1149_s29 + $0x40] ss:$8 sps:$4 sm:$0xff]   ;;  %v785_v10 = vld [vmem:[%s1149_s29 + $0x54] ss:$8 sps:$4 sm:$0xff]  }
  0x5e   : > { %v787_v11 = vld [vmem:[%s1149_s29 + $0x50] ss:$8 sps:$4 sm:$0xff]   ;;  %v788_v12 = vld [vmem:[%s1149_s29 + $0x64] ss:$8 sps:$4 sm:$0xff]   ;;  %v820_v13 = vld [vmem:[#allocation3 + $0x4] ss:$8 sps:$4 sm:$0xff]  }
  0x5f   : > { %v790_v14 = vld [vmem:[%s1149_s29 + $0x60] ss:$8 sps:$4 sm:$0xff]   ;;  %v791_v15 = vld [vmem:[%s1149_s29 + $0x74] ss:$8 sps:$4 sm:$0xff]   ;;  %470 = vmatprep.mubr.bf16.mxu0 %v820_v13  ;;  %v793_v16 = vld [vmem:[%s1149_s29 + $0x70] ss:$8 sps:$4 sm:$0xff]  }
  0x60   : > { %441 = vmatpush1.bf16.msra.mxu0 %v775_v3  ;;  %v794_v17 = vld [vmem:[%s1149_s29 + $0x84] ss:$8 sps:$4 sm:$0xff]   ;;  %v796_v18 = vld [vmem:[%s1149_s29 + $0x80] ss:$8 sps:$4 sm:$0xff]   ;;  %v797_v19 = vld [vmem:[%s1149_s29 + $0x94] ss:$8 sps:$4 sm:$0xff]  }
  0x61   : > { %442 = vmatprep.subr.bf16.mxu0 %v776_v4  ;;  %v799_v20 = vld [vmem:[%s1149_s29 + $0x90] ss:$8 sps:$4 sm:$0xff]   ;;  %v800_v21 = vld [vmem:[%s1149_s29 + $0xa4] ss:$8 sps:$4 sm:$0xff]   ;;  %v802_v22 = vld [vmem:[%s1149_s29 + $0xa0] ss:$8 sps:$4 sm:$0xff]  }
  0x62   : > { %v803_v23 = vld [vmem:[%s1149_s29 + $0xb4] ss:$8 sps:$4 sm:$0xff]   ;;  %v805_v24 = vld [vmem:[%s1149_s29 + $0xb0] ss:$8 sps:$4 sm:$0xff]   ;;  %v806_v25 = vld [vmem:[%s1149_s29 + $0xc4] ss:$8 sps:$4 sm:$0xff]  }
  0x63   : > { %v808_v26 = vld [vmem:[%s1149_s29 + $0xc0] ss:$8 sps:$4 sm:$0xff]   ;;  %v809_v27 = vld [vmem:[%s1149_s29 + $0xd4] ss:$8 sps:$4 sm:$0xff]   ;;  %v811_v28 = vld [vmem:[%s1149_s29 + $0xd0] ss:$8 sps:$4 sm:$0xff]  }
  0x64   : > { %443 = vmatpush1.bf16.msra.mxu0 %v778_v5  ;;  %v812_v29 = vld [vmem:[%s1149_s29 + $0xe4] ss:$8 sps:$4 sm:$0xff]   ;;  %v814_v30 = vld [vmem:[%s1149_s29 + $0xe0] ss:$8 sps:$4 sm:$0xff]   ;;  %v815_v31 = vld [vmem:[%s1149_s29 + $0xf4] ss:$8 sps:$4 sm:$0xff]  }
  0x65   : > { %444 = vmatprep.subr.bf16.mxu0 %v779_v6  ;;  %v817_v32 = vld [vmem:[%s1149_s29 + $0xf0] ss:$8 sps:$4 sm:$0xff]   ;;  %s215_s19 = scalar_lea.vmem [#allocation8], %s645_s17  ;;  %s690_s8 = sshll.u32 %s957_s12, 7 }
  0x66   : > { %v818_v33 = vld [vmem:[#allocation3] ss:$8 sps:$4 sm:$0xff]   ;;  %s527_s22 = sshll.u32 %s215_s19, 4  ;;  %s1194_s6 = scalar_lea.hbm %s1244_s2, %s690_s8  ;;  %s1189_s22 = int_to_ptr.vmem [resolvable:$true] %s527_s22 }
  0x67   : > { %s511_s16 = scalar_lea.sflag [#allocation5], %s1145_s3  ;;  %s879_s4 = scalar_lea.vmem %s1189_s22, 256 }
  0x68   : > { %445 = vmatpush1.bf16.msra.mxu0 %v781_v7  ;;  %p880_p9 = scmp.ne.s32.totalorder %s1189_s22, %s879_s4  ;;  %p1263_p11 = scmp.ne.s32.totalorder %s1254_s20, 0 }
  0x69   : > { %446 = vmatprep.subr.bf16.mxu0 %v782_v8  ;;  %s972_s12 = smov [#allocation8]  }
  0x6a   : > { %p881_p4 = pnand %p880_p9, %p1263_p11  ;;  %s883_s23 = sshll.u32 %s972_s12, 4  ;;  %s884_s23 = int_to_ptr.vmem [resolvable:$false] %s883_s23 }
  0x6b   : > { %s885_s28 = scalar_lea.vmem %s884_s23, 512  ;;  %p886_p0 = scmp.lt.s32.totalorder %s1189_s22, %s884_s23 }
  0x6c   : > { %447 = vmatpush1.bf16.msra.mxu0 %v784_v9  ;;  %p882_p13 = pneg %p881_p4  ;;  %p887_p10 = scmp.lt.s32.totalorder %s885_s28, %s879_s4 }
  0x6d   : > { %448 = vmatprep.subr.bf16.mxu0 %v785_v10 }
  0x6e   : > { %p888_p3 = por %p887_p10, %p886_p0 }
  0x70   : > { %449 = vmatpush1.bf16.msra.mxu0 %v787_v11  ;;  %p889_p6 = pnand %p888_p3, %p882_p13 }
  0x71   : > { %450 = vmatprep.subr.bf16.mxu0 %v788_v12 }
  0x74   : > { %451 = vmatpush1.bf16.msra.mxu0 %v790_v14 }
  0x75   : > { %452 = vmatprep.subr.bf16.mxu0 %v791_v15 }
  0x78   : > { %453 = vmatpush1.bf16.msra.mxu0 %v793_v16 }
  0x79   : > { %454 = vmatprep.subr.bf16.mxu0 %v794_v17 }
  0x7c   : > { %455 = vmatpush1.bf16.msra.mxu0 %v796_v18 }
  0x7d   : > { %456 = vmatprep.subr.bf16.mxu0 %v797_v19 }
  0x80   : > { %457 = vmatpush1.bf16.msra.mxu0 %v799_v20 }
  0x81   : > { %458 = vmatprep.subr.bf16.mxu0 %v800_v21 }
  0x84   : > { %459 = vmatpush1.bf16.msra.mxu0 %v802_v22 }
  0x85   : > { %460 = vmatprep.subr.bf16.mxu0 %v803_v23 }
  0x88   : > { %461 = vmatpush1.bf16.msra.mxu0 %v805_v24 }
  0x89   : > { %462 = vmatprep.subr.bf16.mxu0 %v806_v25 }
  0x8c   : > { %463 = vmatpush1.bf16.msra.mxu0 %v808_v26 }
  0x8d   : > { %464 = vmatprep.subr.bf16.mxu0 %v809_v27 }
  0x90   : > { %465 = vmatpush1.bf16.msra.mxu0 %v811_v28 }
  0x91   : > { %466 = vmatprep.subr.bf16.mxu0 %v812_v29 }
  0x94   : > { %467 = vmatpush1.bf16.msra.mxu0 %v814_v30 }
  0x95   : > { %468 = vmatprep.subr.bf16.mxu0 %v815_v31 }
  0x98   : > { %469 = vmatpush1.bf16.msra.mxu0 %v817_v32 }
  0x9b   : > { %471 = vmatmul.mubr.bf16.vlgmr.msra.gmra.mrb[0].mxu0 %v818_v33 }
 0x16e   : > { %v472_v34 = vpop.f32.mrb[0].mxu0 }
 0x16f   : > { %v474_v35 = vpop.f32.mrb[1].mxu0 }
 0x170   : > { %v688_v36 = vpack.c.bf16 %v474_v35, %v472_v34  ;;  %v476_v37 = vpop.f32.mrb[2].mxu0 }
 0x171   : > { %v478_v38 = vpop.f32.mrb[3].mxu0 }
 0x172   : > { %508 = vst [vmem:[%s215_s19] sm:$0xff] %v688_v36  ;;  %v689_v39 = vpack.c.bf16 %v478_v38, %v476_v37 }
 0x174   : > { %509 = vst [vmem:[%s215_s19 + $0x8] sm:$0xff] %v689_v39 }
 0x175   : > { %892 = shalt.err (!%p889_p6)
}
 0x176   : > { %s893_s24 = scalar_lea.hbm %s1194_s6, 256  ;;  %s897_s26 = scalar_lea.hbm %s1244_s2, 1024 }
 0x177   : > { %p894_p1 = scmp.ne.s32.totalorder %s1194_s6, %s893_s24  ;;  %p898_p12 = scmp.lt.u32.totalorder %s1194_s6, %s1244_s2 }
 0x178   : > { %p899_p2 = scmp.lt.u32.totalorder %s897_s26, %s893_s24  ;;  %p901_p9 = scmp.lt.u32.totalorder %s893_s24, %s1194_s6 }
 0x179   : > { %p895_p5 = pnand %p894_p1, %p1263_p11 }
 0x17a   : > { %p900_p8 = por %p899_p2, %p898_p12 }
 0x17b   : > { %p896_p7 = pneg %p895_p5 }
 0x17c   : > { %p902_p4 = por %p901_p9, %p900_p8 }
 0x17e   : > { %p903_p13 = pnand %p902_p4, %p896_p7 }
 0x180   : > { %906 = shalt.err (!%p903_p13)
}
 0x181   : > { %s973_s17 = smov 128   ;;  %s974_s19 = smov 512  }
 0x182   : > { %s975_s8 = smov 8  }
 0x183   : > { %697 = dma.vmem_to_hbm [thread:$0]  (%p1263_p11), %s1189_s22, 256, %s1194_s6, %s511_s16, %s973_s17, %s974_s19, %s975_s8  }
 0x184 PF: > { %p714_p0 = scmp.ge.s32.totalorder %s965_s14, 2  ;;  %s542_s15 = sand.u32 1, %s945_s9  }
 0x185   : > { %p1264_p10 = scmp.ne.s32.totalorder %s1255_s21, 0  ;;  %s543_s5 = scalar_lea.sflag [#allocation5], %s542_s15 }
 0x187   : > { %p708_p3 = pnand %p714_p0, %p1264_p10 }
 0x189   : > { %940 = dma.done.wait (!%p708_p3), %s543_s5, 256  }
 0x18a   : > { %942 = vsyncadd (!%p708_p3), %s543_s5, 4294967040  ;;  %s19_s14 = sadd.s32 1, %s965_s14   ;;  %s1265_s9 = smov %s949_s10 }
 0x18b   : > { %p16_p6 = scmp.ge.s32.totalorder %s19_s14, 6   ;;  %s1266_s10 = smov %s953_s11 }
 0x18c   : > { %s1267_s11 = smov %s1104_s7  ;;  %s1268_s12 = smov %s961_s13 }
 0x18d   : > { %s1269_s13 = smov %s1271_s27  ;;  %18 = sbr.rel (!%p16_p6) target bundleno = 7 (0x7), region = 87 }
 0x194   :  { %548 = vsyncpa [#allocation4], 1 }
 0x195   :  { %550 = vsyncpa [#allocation4 + $0x1], 1 }
 0x196   :  { %551 = vsyncpa [#allocation7], 1 }
 0x197   :  { %553 = vsyncpa [#allocation7 + $0x1], 1 }
 0x198   :  { %554 = vsyncpa [#allocation5], 1 }
 0x199   :  { %556 = vsyncpa [#allocation5 + $0x1], 1 }

</bundles_post_ra>
